<compile_context>
chip_gen: v5e
topology: v5e:2x2
jax: 0.10.0
libtpu: 0.0.40
codegen_flags: <defaults>
</compile_context>

<pallas_src>
import functools

import jax
import jax.numpy as jnp
from jax.experimental import pallas as pl
from jax.experimental.pallas import tpu as pltpu

IN_FEATURES = 100
OUT_FEATURES = 100
LANE = 128
SUBLANE = 8
MAX_TILE_ROWS = 2048


def _cdiv(a, b):
    return (a + b - 1) // b


def _round_up(n, m):
    return _cdiv(n, m) * m


def _linear_kernel(x_ref, w_ref, b_ref, o_ref):
    # x_ref: (tb, INp)   w_ref: (INp, OUTp)   b_ref: (1, OUTp)   o_ref: (tb, OUT)
    acc = jnp.dot(x_ref[...], w_ref[...], preferred_element_type=jnp.float32)
    out = acc + b_ref[...]
    # Drop the OUT padding lanes on-vreg; o_ref is the logical-width tile.
    o_ref[...] = out[:, : o_ref.shape[1]].astype(o_ref.dtype)


def prepare_params(weight, bias):
    """One-time prep (module-init scope).

    Transposes the torch (OUT, IN) weight to (IN, OUT) and zero-pads both
    params to lane-aligned shapes:
        weight (OUT, IN) -> (INp, OUTp);  bias (OUT,) -> (1, OUTp).
    The zero K-padding rows guarantee x's padded lanes contribute exactly 0.
    """
    out_f, in_f = weight.shape
    in_p = _round_up(in_f, LANE)
    out_p = _round_up(out_f, LANE)
    w_p = jnp.zeros((in_p, out_p), weight.dtype).at[:in_f, :out_f].set(weight.T)
    b_p = jnp.zeros((1, out_p), bias.dtype).at[0, :out_f].set(bias)
    return w_p, b_p


def _pick_batch_tile(batch):
    if batch <= SUBLANE:
        # Single full-array block (block dim == full array dim is allowed).
        return batch
    # >= 2 grid steps so the "parallel" batch axis shards across both v7x
    # TensorCores; tile rows a multiple of 8, capped at 2048 to amortize the
    # per-step overhead at large B (VMEM stays well under limits).
    return max(SUBLANE, min(MAX_TILE_ROWS, _round_up(_cdiv(batch, 2), SUBLANE)))


@functools.partial(jax.jit, static_argnames=("out_features",))
def linear_pallas(x, w_p, b_p, out_features=OUT_FEATURES):
    """y = x @ W.T + b with W pre-transposed/padded to (INp, OUTp)."""
    B, in_f = x.shape
    in_p, out_p = w_p.shape

    # Only the feature dim needs padding (lane alignment). No batch pad.
    if in_f != in_p:
        x = jnp.pad(x, ((0, 0), (0, in_p - in_f)))

    tb = _pick_batch_tile(B)
    grid = (_cdiv(B, tb),)

    # TODO(synk): optional bf16 activation/weight path (halves HBM traffic)
    # deviates from torch f32 Linear numerics, so it is not enabled here.
    return pl.pallas_call(
        _linear_kernel,
        out_shape=jax.ShapeDtypeStruct((B, out_features), x.dtype),
        grid=grid,
        in_specs=[
            pl.BlockSpec((tb, in_p), lambda i: (i, 0)),
            pl.BlockSpec((in_p, out_p), lambda i: (0, 0)),   # resident weight
            pl.BlockSpec((1, out_p), lambda i: (0, 0)),      # resident bias
        ],
        out_specs=pl.BlockSpec((tb, out_features), lambda i: (i, 0)),
        compiler_params=pltpu.CompilerParams(
            dimension_semantics=("parallel",),
        ),
        cost_estimate=pl.CostEstimate(
            flops=2 * B * in_p * out_p,
            transcendentals=0,
            bytes_accessed=4 * (B * in_p + in_p * out_p + out_p + B * out_features),
        ),
    )(x, w_p, b_p)


if __name__ == "__main__":
    key = jax.random.PRNGKey(0)
    k_x, k_w, k_b, k_x2 = jax.random.split(key, 4)

    IN, OUT = IN_FEATURES, OUT_FEATURES
    # Deterministic params mimicking torch.nn.Linear default init:
    # uniform(-1/sqrt(IN), 1/sqrt(IN)), torch (OUT, IN) layout.
    bound = 1.0 / (IN ** 0.5)
    weight = jax.random.uniform(k_w, (OUT, IN), jnp.float32, -bound, bound)
    bias = jax.random.uniform(k_b, (OUT,), jnp.float32, -bound, bound)

    # One-time parameter prep (transpose + pad).
    w_p, b_p = prepare_params(weight, bias)

    # Aligned small batch.
    B = 8
    x = jax.random.normal(k_x, (B, IN), jnp.float32)
    y = linear_pallas(x, w_p, b_p)
    jax.block_until_ready(y)
    y_ref = x @ weight.T + bias
    assert y.shape == (B, OUT)
    assert jnp.allclose(y, y_ref, atol=1e-5, rtol=1e-5)

    # Ragged batch: exercises grid = cdiv(B, tb) with a clipped last tile.
    B2 = 13
    x2 = jax.random.normal(k_x2, (B2, IN), jnp.float32)
    y2 = linear_pallas(x2, w_p, b_p)
    jax.block_until_ready(y2)
    y2_ref = x2 @ weight.T + bias
    assert y2.shape == (B2, OUT)
    assert jnp.allclose(y2, y2_ref, atol=1e-5, rtol=1e-5)

    print("KERNEL_OK")
</pallas_src>

<mosaic_0001>
module attributes {stable_mosaic.version = 11 : i64} {
  func.func @_linear_kernel(%arg0: i32, %arg1: memref<8x128xf32, #tpu.memory_space<vmem>>, %arg2: memref<128x128xf32, #tpu.memory_space<vmem>>, %arg3: memref<1x128xf32, #tpu.memory_space<vmem>>, %arg4: memref<8x100xf32, #tpu.memory_space<vmem>>) attributes {dimension_semantics = [#tpu.dimension_semantics<parallel>], iteration_bounds = array<i64: 1>, scalar_prefetch = 0 : i64, scratch_operands = 0 : i64, tpu.core_type = #tpu.core_type<tc>, window_params = [{transform_indices = @transform_0, window_bounds = array<i64: 8, 128>}, {pipeline_mode = #tpu.pipeline_mode<synchronous>, transform_indices = @transform_1, window_bounds = array<i64: 128, 128>}, {pipeline_mode = #tpu.pipeline_mode<synchronous>, transform_indices = @transform_2, window_bounds = array<i64: 1, 128>}, {transform_indices = @transform_3, window_bounds = array<i64: 8, 100>}]} {
    %c0 = arith.constant 0 : index
    %c0_0 = arith.constant 0 : index
    %0 = vector.load %arg1[%c0, %c0_0] : memref<8x128xf32, #tpu.memory_space<vmem>>, vector<8x128xf32>
    %c0_1 = arith.constant 0 : index
    %c0_2 = arith.constant 0 : index
    %1 = vector.load %arg2[%c0_1, %c0_2] : memref<128x128xf32, #tpu.memory_space<vmem>>, vector<128x128xf32>
    %cst = arith.constant dense<0.000000e+00> : vector<8x128xf32>
    %2 = tpu.matmul %0, %1, %cst {dimension_numbers = #tpu.dot_dimension_numbers<[1], [0], [0], [1], [0, 0, 1, 1], [], []>} : vector<8x128xf32>, vector<128x128xf32>, vector<8x128xf32> -> vector<8x128xf32>
    %c0_3 = arith.constant 0 : index
    %c0_4 = arith.constant 0 : index
    %3 = vector.load %arg3[%c0_3, %c0_4] : memref<1x128xf32, #tpu.memory_space<vmem>>, vector<1x128xf32>
    %4 = vector.broadcast %3 : vector<1x128xf32> to vector<8x128xf32>
    %5 = arith.addf %2, %4 : vector<8x128xf32>
    %6 = vector.extract_strided_slice %5 {offsets = [0, 0], sizes = [8, 100], strides = [1, 1]} : vector<8x128xf32> to vector<8x100xf32>
    %c0_5 = arith.constant 0 : index
    %c0_6 = arith.constant 0 : index
    %7 = vector.load %arg4[%c0_5, %c0_6] : memref<8x100xf32, #tpu.memory_space<vmem>>, vector<8x100xf32>
    tpu.vector_store %arg4[%c0_5, %c0_6], %6 {strides = array<i32>} : memref<8x100xf32, #tpu.memory_space<vmem>>, vector<8x100xf32>,
    return
  }
  func.func @transform_0(%arg0: i32) -> (i32, i32) {
    %c0_i32 = arith.constant 0 : i32
    %c0_i32_0 = arith.constant 0 : i32
    return %arg0, %c0_i32 : i32, i32
  }
  func.func @transform_1(%arg0: i32) -> (i32, i32) {
    %c0_i32 = arith.constant 0 : i32
    %c0_i32_0 = arith.constant 0 : i32
    %c0_i32_1 = arith.constant 0 : i32
    return %c0_i32, %c0_i32_0 : i32, i32
  }
  func.func @transform_2(%arg0: i32) -> (i32, i32) {
    %c0_i32 = arith.constant 0 : i32
    %c0_i32_0 = arith.constant 0 : i32
    %c0_i32_1 = arith.constant 0 : i32
    return %c0_i32, %c0_i32_0 : i32, i32
  }
  func.func @transform_3(%arg0: i32) -> (i32, i32) {
    %c0_i32 = arith.constant 0 : i32
    %c0_i32_0 = arith.constant 0 : i32
    return %arg0, %c0_i32 : i32, i32
  }
}

</mosaic_0001>

<bundles_post_ra>
// kernel: linear_pallas.1
= control target key start
LH: loop header
LB: loop body
LE: loop exit
PB: predicated region body
PF: predicated region fallthrough
CT: control target
= control target key end

     0   :  { %8 = vsyncpa [#allocation3], 0  ;;  %s184_s0 = inlined_call_operand.vmem [shape: f32[8,128], index: 0, kind: input, shape index: {}]   ;;  %s185_s1 = inlined_call_operand.hbm [shape: f32[128,128], index: 1, kind: input, shape index: {}]   ;;  %s186_s2 = inlined_call_operand.vmem [shape: f32[1,128], index: 2, kind: input, shape index: {}]   ;;  %s187_s3 = inlined_call_operand.hbm [shape: f32[8,100], index: 3, kind: output, shape index: {}]  }
   0x1   :  { %9 = vsyncpa [#allocation4], 0  ;;  %s16_s14 = sshll.u32 %s185_s1, 4  ;;  %s148_s15 = smov [#allocation2]   ;;  %s17_s14 = int_to_ptr.hbm [resolvable:$true] %s16_s14 }
   0x2   :  { %s18_s16 = sshll.u32 %s148_s15, 4  ;;  %s149_s17 = smov 128   ;;  %s19_s16 = int_to_ptr.vmem [resolvable:$true] %s18_s16 }
   0x3   :  { %s150_s18 = smov 8  }
   0x4   :  { %24 = dma.hbm_to_vmem [thread:$0]  %s17_s14, 2048, %s19_s16, [#allocation3], %s149_s17, %s149_s17, %s150_s18  }
   0x5   :  { %144 = dma.done.wait [#allocation3], 2048  }
   0x6   :  { %145 = vsyncadd [#allocation3], 4294965248  ;;  %v47_v0 = vld [vmem:[#allocation2 + $0x78] sm:$0xff]  ;;  %v46_v1 = vld [vmem:[#allocation2 + $0x70] sm:$0xff]  ;;  %s151_s22 = smov [#allocation5]   ;;  %s81_s26 = sshll.u32 %s187_s3, 4  ;;  %s82_s26 = int_to_ptr.hbm [resolvable:$true] %s81_s26 }
   0x7   :  { %52 = vmatpush.msra.mxu0 %v47_v0  ;;  %v45_v2 = vld [vmem:[#allocation2 + $0x68] sm:$0xff]  ;;  %v44_v3 = vld [vmem:[#allocation2 + $0x60] sm:$0xff]  ;;  %v43_v4 = vld [vmem:[#allocation2 + $0x58] sm:$0xff]  ;;  %s79_s23 = sshll.u32 %s151_s22, 4  ;;  %vm72_vm0 = vcmask 818176   ;;  %s80_s23 = int_to_ptr.vmem [resolvable:$true] %s79_s23 }
   0x8   :  { %v42_v5 = vld [vmem:[#allocation2 + $0x50] sm:$0xff]  ;;  %v41_v6 = vld [vmem:[#allocation2 + $0x48] sm:$0xff]  ;;  %v40_v7 = vld [vmem:[#allocation2 + $0x40] sm:$0xff] }
   0x9   :  { %53 = vmatpush.msra.mxu0 %v46_v1  ;;  %v39_v8 = vld [vmem:[#allocation2 + $0x38] sm:$0xff]  ;;  %v38_v9 = vld [vmem:[#allocation2 + $0x30] sm:$0xff]  ;;  %v37_v10 = vld [vmem:[#allocation2 + $0x28] sm:$0xff] }
   0xa   :  { %v36_v11 = vld [vmem:[#allocation2 + $0x20] sm:$0xff]  ;;  %v35_v12 = vld [vmem:[#allocation2 + $0x18] sm:$0xff]  ;;  %v34_v13 = vld [vmem:[#allocation2 + $0x10] sm:$0xff] }
   0xb   :  { %54 = vmatpush.msra.mxu0 %v45_v2  ;;  %v33_v14 = vld [vmem:[#allocation2 + $0x8] sm:$0xff]  ;;  %v32_v15 = vld [vmem:[#allocation2] sm:$0xff] }
   0xc   :  { %v31_v16 = vld [vmem:[%s184_s0] sm:$0xff] }
   0xd   :  { %55 = vmatpush.msra.mxu0 %v44_v3  ;;  %v95_v17 = vld [vmem:[%s186_s2] ss:$0 sm:$0xff] }
   0xf   :  { %56 = vmatpush.msra.mxu0 %v43_v4 }
  0x11   :  { %57 = vmatpush.msra.mxu0 %v42_v5 }
  0x13   :  { %58 = vmatpush.msra.mxu0 %v41_v6 }
  0x15   :  { %59 = vmatpush.msra.mxu0 %v40_v7 }
  0x17   :  { %60 = vmatpush.msra.mxu0 %v39_v8 }
  0x19   :  { %61 = vmatpush.msra.mxu0 %v38_v9 }
  0x1b   :  { %62 = vmatpush.msra.mxu0 %v37_v10 }
  0x1d   :  { %63 = vmatpush.msra.mxu0 %v36_v11 }
  0x1f   :  { %64 = vmatpush.msra.mxu0 %v35_v12 }
  0x21   :  { %65 = vmatpush.msra.mxu0 %v34_v13 }
  0x23   :  { %66 = vmatpush.msra.mxu0 %v33_v14 }
  0x25   :  { %67 = vmatpush.msra.mxu0 %v32_v15 }
  0x26   :  { %68 = vmatmul.f32.vlgmr.msra.gmra.mxu0 %v31_v16 }
  0xa3   :  { %v69_v18 = vpop.f32.mrf.mxu0 }
  0xa4   :  { %v70_v19 = vadd.f32 %v95_v17, %v69_v18 }
  0xa6   :  { %73 = vst.msk [vmem:[#allocation5] sm:$0xff] %vm72_vm0, %v70_v19 }
  0xa7   :  { %84 = dma.vmem_to_hbm [thread:$0]  %s80_s23, 128, %s82_s26, [#allocation4]  }
  0xa8   :  { %146 = dma.done.wait [#allocation4], 128  }
  0xa9   :  { %147 = vsyncadd [#allocation4], 4294967168 }
  0xaa   :  { %89 = vsyncpa [#allocation3], 1 }
  0xab   :  { %90 = vsyncpa [#allocation4], 1 }

</bundles_post_ra>
